<compile_context>
chip_gen: v7x
topology: tpu7x:2x2x1
jax: 0.10.0
libtpu: 0.0.40
codegen_flags: <defaults>
</compile_context>

<pallas_src>
import jax
import jax.numpy as jnp
from jax.experimental import pallas as pl
from jax.experimental.pallas import tpu as pltpu


def actor_kernel(x_ref, w1_ref, b1_ref, w2_ref, b2_ref, wmu_ref, bmu_ref, out_ref):
    # Layer 1: relu(x @ W1 + b1)   (bf16 MXU operands, f32 accumulate + f32 epilogue)
    h = jnp.dot(x_ref[...], w1_ref[...], preferred_element_type=jnp.float32) + b1_ref[...]
    h = jnp.maximum(h, 0.0).astype(jnp.bfloat16)

    # Layer 2: relu(h @ W2 + b2)
    h = jnp.dot(h, w2_ref[...], preferred_element_type=jnp.float32) + b2_ref[...]
    h = jnp.maximum(h, 0.0).astype(jnp.bfloat16)

    # Head: tanh(h @ Wmu + bmu)   (tanh goes to the EUP; keep it in f32)
    mu = jnp.dot(h, wmu_ref[...], preferred_element_type=jnp.float32) + bmu_ref[...]
    out_ref[...] = jnp.tanh(mu).astype(out_ref.dtype)


def _select_batch_tile(B, block_rows):
    """Pick a batch tile: full batch when tiny, else >=2 balanced 16-aligned tiles."""
    block_rows = max(16, (block_rows // 16) * 16)  # keep tiles sublane-tile aligned
    if B <= 16:
        return B                                   # single tile == full batch dim
    n_steps = max(2, pl.cdiv(B, block_rows))       # >=2 steps: shards across v7x's 2 TCs
    tb = pl.cdiv(B, n_steps)
    tb = ((tb + 15) // 16) * 16                    # bf16 sublane tile = 16 rows
    return min(tb, block_rows)


def actor_forward(x, params, *, block_rows=2048):
    """Pallas forward of Actor_. x: (B, input_dim) f32."""
    w1, b1, w2, b2, wmu, bmu = params
    B, D = x.shape
    H = w1.shape[1]
    A = wmu.shape[1]

    # One-time operand prep outside the kernel: bf16 MXU operands (weights AND the
    # streamed activation x), f32 biases.
    xb = x.astype(jnp.bfloat16)
    w1b = w1.astype(jnp.bfloat16)
    w2b = w2.astype(jnp.bfloat16)
    wmub = wmu.astype(jnp.bfloat16)

    TB = _select_batch_tile(B, block_rows)
    grid = (pl.cdiv(B, TB),)

    # Constant index_map -> weights stay VMEM-resident across grid steps.  Only
    # single-buffer them when they are big enough for the duplicate to matter
    # (keeps large-H configs inside v7x's 64 MiB VMEM; a no-op at H=128).
    weight_bytes = 2 * (D * H + H * H + H * A) + 4 * (2 * H + A)
    single_buffer_weights = weight_bytes > (4 << 20)

    def resident(shape):
        if single_buffer_weights:
            return pl.BlockSpec(shape, lambda i: (0, 0), pipeline_mode=pl.Buffered(1))
        return pl.BlockSpec(shape, lambda i: (0, 0))

    # Explicit VMEM budget: resident weights (+double-buffer if applicable),
    # double-buffered x/out tiles, and f32 activation headroom.
    buf_mult = 1 if single_buffer_weights else 2
    vmem_est = (buf_mult * weight_bytes
                + 2 * (TB * D * 2 + TB * A * 4)
                + 4 * TB * H * 4)
    vmem_limit = int(min(128 * 1024 * 1024, max(32 * 1024 * 1024, vmem_est * 3 // 2)))

    cost = pl.CostEstimate(
        flops=2 * B * (D * H + H * H + H * A),
        transcendentals=B * A,  # tanh
        bytes_accessed=(B * D * 2 + B * A * 4          # streamed x (bf16) + out (f32)
                        + weight_bytes),
    )

    return pl.pallas_call(
        actor_kernel,
        out_shape=jax.ShapeDtypeStruct((B, A), jnp.float32),
        grid=grid,
        in_specs=[
            pl.BlockSpec((TB, D), lambda i: (i, 0)),   # x: tiled over batch
            resident((D, H)), resident((1, H)),        # W1, b1
            resident((H, H)), resident((1, H)),        # W2, b2
            resident((H, A)), resident((1, A)),        # Wmu, bmu
        ],
        out_specs=pl.BlockSpec((TB, A), lambda i: (i, 0)),
        compiler_params=pltpu.CompilerParams(
            dimension_semantics=("parallel",),
            vmem_limit_bytes=vmem_limit),
        cost_estimate=cost,
    )(xb, w1b, b1, w2b, b2, wmub, bmu)


def init_actor_params(key, input_dim, action_dim, hidden_dim=128):
    """PyTorch-style uniform(-1/sqrt(fan_in), 1/sqrt(fan_in)) init."""
    def linear(key, fan_in, fan_out):
        kw, kb = jax.random.split(key)
        bound = 1.0 / jnp.sqrt(fan_in)
        w = jax.random.uniform(kw, (fan_in, fan_out), jnp.float32, -bound, bound)
        b = jax.random.uniform(kb, (1, fan_out), jnp.float32, -bound, bound)
        return w, b

    k1, k2, k3 = jax.random.split(key, 3)
    w1, b1 = linear(k1, input_dim, hidden_dim)
    w2, b2 = linear(k2, hidden_dim, hidden_dim)
    wmu, bmu = linear(k3, hidden_dim, action_dim)
    return (w1, b1, w2, b2, wmu, bmu)


def actor_reference(x, params):
    """Pure-JAX f32 reference of the PyTorch Actor_ forward."""
    w1, b1, w2, b2, wmu, bmu = params
    h = jax.nn.relu(x @ w1 + b1)
    h = jax.nn.relu(h @ w2 + b2)
    return jnp.tanh(h @ wmu + bmu)


if __name__ == "__main__":
    key = jax.random.PRNGKey(0)
    k_in, k_in2, k_par = jax.random.split(key, 3)

    batch = 2
    input_dim = 8
    action_dim = 4
    hidden_dim = 128   # module default; keeps lanes reasonably utilized

    params = init_actor_params(k_par, input_dim, action_dim, hidden_dim)

    # Small-batch path (single full-batch tile).
    x = jax.random.normal(k_in, (batch, input_dim), jnp.float32)
    out = jax.block_until_ready(actor_forward(x, params))
    ref = actor_reference(x, params)
    assert out.shape == (batch, action_dim)
    # Tolerance relaxed for bf16 MXU operands (f32 accumulation).
    assert jnp.allclose(out, ref, atol=2e-2, rtol=2e-2), (out, ref)

    # Multi-tile path: >=2 balanced grid steps + ragged final tile (masked writeback).
    x2 = jax.random.normal(k_in2, (400, input_dim), jnp.float32)
    out2 = jax.block_until_ready(actor_forward(x2, params, block_rows=128))
    ref2 = actor_reference(x2, params)
    assert out2.shape == (400, action_dim)
    assert jnp.allclose(out2, ref2, atol=2e-2, rtol=2e-2)

    print("KERNEL_OK")
</pallas_src>

<mosaic_0001>
module attributes {stable_mosaic.version = 11 : i64} {
  func.func @actor_kernel(%arg0: i32, %arg1: memref<2x8xbf16, #tpu.memory_space<vmem>>, %arg2: memref<8x128xbf16, #tpu.memory_space<vmem>>, %arg3: memref<1x128xf32, #tpu.memory_space<vmem>>, %arg4: memref<128x128xbf16, #tpu.memory_space<vmem>>, %arg5: memref<1x128xf32, #tpu.memory_space<vmem>>, %arg6: memref<128x4xbf16, #tpu.memory_space<vmem>>, %arg7: memref<1x4xf32, #tpu.memory_space<vmem>>, %arg8: memref<2x4xf32, #tpu.memory_space<vmem>>) attributes {dimension_semantics = [#tpu.dimension_semantics<parallel>], iteration_bounds = array<i64: 1>, scalar_prefetch = 0 : i64, scratch_operands = 0 : i64, tpu.core_type = #tpu.core_type<tc>, window_params = [{transform_indices = @transform_0, window_bounds = array<i64: 2, 8>}, {pipeline_mode = #tpu.pipeline_mode<synchronous>, transform_indices = @transform_1, window_bounds = array<i64: 8, 128>}, {pipeline_mode = #tpu.pipeline_mode<synchronous>, transform_indices = @transform_2, window_bounds = array<i64: 1, 128>}, {pipeline_mode = #tpu.pipeline_mode<synchronous>, transform_indices = @transform_3, window_bounds = array<i64: 128, 128>}, {pipeline_mode = #tpu.pipeline_mode<synchronous>, transform_indices = @transform_4, window_bounds = array<i64: 1, 128>}, {pipeline_mode = #tpu.pipeline_mode<synchronous>, transform_indices = @transform_5, window_bounds = array<i64: 128, 4>}, {pipeline_mode = #tpu.pipeline_mode<synchronous>, transform_indices = @transform_6, window_bounds = array<i64: 1, 4>}, {transform_indices = @transform_7, window_bounds = array<i64: 2, 4>}]} {
    %c0 = arith.constant 0 : index
    %c0_0 = arith.constant 0 : index
    %0 = vector.load %arg1[%c0, %c0_0] : memref<2x8xbf16, #tpu.memory_space<vmem>>, vector<2x8xbf16>
    %c0_1 = arith.constant 0 : index
    %c0_2 = arith.constant 0 : index
    %1 = vector.load %arg2[%c0_1, %c0_2] : memref<8x128xbf16, #tpu.memory_space<vmem>>, vector<8x128xbf16>
    %cst = arith.constant dense<0.000000e+00> : vector<2x128xf32>
    %2 = tpu.matmul %0, %1, %cst {dimension_numbers = #tpu.dot_dimension_numbers<[1], [0], [0], [1], [0, 0, 1, 1], [], []>} : vector<2x8xbf16>, vector<8x128xbf16>, vector<2x128xf32> -> vector<2x128xf32>
    %c0_3 = arith.constant 0 : index
    %c0_4 = arith.constant 0 : index
    %3 = vector.load %arg3[%c0_3, %c0_4] : memref<1x128xf32, #tpu.memory_space<vmem>>, vector<1x128xf32>
    %4 = vector.broadcast %3 : vector<1x128xf32> to vector<2x128xf32>
    %5 = arith.addf %2, %4 : vector<2x128xf32>
    %cst_5 = arith.constant 0.000000e+00 : f32
    %6 = vector.broadcast %cst_5 : f32 to vector<2x128xf32>
    %7 = arith.maximumf %5, %6 : vector<2x128xf32>
    %8 = arith.truncf %7 : vector<2x128xf32> to vector<2x128xbf16>
    %c0_6 = arith.constant 0 : index
    %c0_7 = arith.constant 0 : index
    %9 = vector.load %arg4[%c0_6, %c0_7] : memref<128x128xbf16, #tpu.memory_space<vmem>>, vector<128x128xbf16>
    %cst_8 = arith.constant dense<0.000000e+00> : vector<2x128xf32>
    %10 = tpu.matmul %8, %9, %cst_8 {dimension_numbers = #tpu.dot_dimension_numbers<[1], [0], [0], [1], [0, 0, 1, 1], [], []>} : vector<2x128xbf16>, vector<128x128xbf16>, vector<2x128xf32> -> vector<2x128xf32>
    %c0_9 = arith.constant 0 : index
    %c0_10 = arith.constant 0 : index
    %11 = vector.load %arg5[%c0_9, %c0_10] : memref<1x128xf32, #tpu.memory_space<vmem>>, vector<1x128xf32>
    %12 = vector.broadcast %11 : vector<1x128xf32> to vector<2x128xf32>
    %13 = arith.addf %10, %12 : vector<2x128xf32>
    %cst_11 = arith.constant 0.000000e+00 : f32
    %14 = vector.broadcast %cst_11 : f32 to vector<2x128xf32>
    %15 = arith.maximumf %13, %14 : vector<2x128xf32>
    %16 = arith.truncf %15 : vector<2x128xf32> to vector<2x128xbf16>
    %c0_12 = arith.constant 0 : index
    %c0_13 = arith.constant 0 : index
    %17 = vector.load %arg6[%c0_12, %c0_13] : memref<128x4xbf16, #tpu.memory_space<vmem>>, vector<128x4xbf16>
    %cst_14 = arith.constant dense<0.000000e+00> : vector<2x4xf32>
    %18 = tpu.matmul %16, %17, %cst_14 {dimension_numbers = #tpu.dot_dimension_numbers<[1], [0], [0], [1], [0, 0, 1, 1], [], []>} : vector<2x128xbf16>, vector<128x4xbf16>, vector<2x4xf32> -> vector<2x4xf32>
    %c0_15 = arith.constant 0 : index
    %c0_16 = arith.constant 0 : index
    %19 = vector.load %arg7[%c0_15, %c0_16] : memref<1x4xf32, #tpu.memory_space<vmem>>, vector<1x4xf32>
    %20 = vector.broadcast %19 : vector<1x4xf32> to vector<2x4xf32>
    %21 = arith.addf %18, %20 : vector<2x4xf32>
    %22 = math.tanh %21 : vector<2x4xf32>
    %c0_17 = arith.constant 0 : index
    %c0_18 = arith.constant 0 : index
    %23 = vector.load %arg8[%c0_17, %c0_18] : memref<2x4xf32, #tpu.memory_space<vmem>>, vector<2x4xf32>
    tpu.vector_store %arg8[%c0_17, %c0_18], %22 {strides = array<i32>} : memref<2x4xf32, #tpu.memory_space<vmem>>, vector<2x4xf32>,
    return
  }
  func.func @transform_0(%arg0: i32) -> (i32, i32) {
    %c0_i32 = arith.constant 0 : i32
    %c0_i32_0 = arith.constant 0 : i32
    return %arg0, %c0_i32 : i32, i32
  }
  func.func @transform_1(%arg0: i32) -> (i32, i32) {
    %c0_i32 = arith.constant 0 : i32
    %c0_i32_0 = arith.constant 0 : i32
    %c0_i32_1 = arith.constant 0 : i32
    return %c0_i32, %c0_i32_0 : i32, i32
  }
  func.func @transform_2(%arg0: i32) -> (i32, i32) {
    %c0_i32 = arith.constant 0 : i32
    %c0_i32_0 = arith.constant 0 : i32
    %c0_i32_1 = arith.constant 0 : i32
    return %c0_i32, %c0_i32_0 : i32, i32
  }
  func.func @transform_3(%arg0: i32) -> (i32, i32) {
    %c0_i32 = arith.constant 0 : i32
    %c0_i32_0 = arith.constant 0 : i32
    %c0_i32_1 = arith.constant 0 : i32
    return %c0_i32, %c0_i32_0 : i32, i32
  }
  func.func @transform_4(%arg0: i32) -> (i32, i32) {
    %c0_i32 = arith.constant 0 : i32
    %c0_i32_0 = arith.constant 0 : i32
    %c0_i32_1 = arith.constant 0 : i32
    return %c0_i32, %c0_i32_0 : i32, i32
  }
  func.func @transform_5(%arg0: i32) -> (i32, i32) {
    %c0_i32 = arith.constant 0 : i32
    %c0_i32_0 = arith.constant 0 : i32
    %c0_i32_1 = arith.constant 0 : i32
    return %c0_i32, %c0_i32_0 : i32, i32
  }
  func.func @transform_6(%arg0: i32) -> (i32, i32) {
    %c0_i32 = arith.constant 0 : i32
    %c0_i32_0 = arith.constant 0 : i32
    %c0_i32_1 = arith.constant 0 : i32
    return %c0_i32, %c0_i32_0 : i32, i32
  }
  func.func @transform_7(%arg0: i32) -> (i32, i32) {
    %c0_i32 = arith.constant 0 : i32
    %c0_i32_0 = arith.constant 0 : i32
    return %arg0, %c0_i32 : i32, i32
  }
}

</mosaic_0001>

<bundles_post_ra>
// kernel: tpu_custom_call.1
= control target key start
LH: loop header
LB: loop body
LE: loop exit
PB: predicated region body
PF: predicated region fallthrough
CT: control target
= control target key end

     0   :  { %vm41_vm0 = vcmask 1043456   ;;  %vm37_vm1 = vcmask 64512   ;;  %v459_v1 = vmov 0.0   ;;  %vm460_vm2 = vmmov 0   ;;  %s597_s0 = inlined_call_operand.vmem [shape: bf16[2,8], index: 0, kind: input, shape index: {}]   ;;  %s598_s1 = inlined_call_operand.vmem [shape: bf16[8,128], index: 1, kind: input, shape index: {}]   ;;  %s599_s2 = inlined_call_operand.vmem [shape: f32[1,128], index: 2, kind: input, shape index: {}]   ;;  %s600_s3 = inlined_call_operand.vmem [shape: bf16[128,128], index: 3, kind: input, shape index: {}]   ;;  %s601_s4 = inlined_call_operand.vmem [shape: f32[1,128], index: 4, kind: input, shape index: {}]   ;;  %s602_s5 = inlined_call_operand.vmem [shape: bf16[128,4], index: 5, kind: input, shape index: {}]   ;;  %s603_s6 = inlined_call_operand.vmem [shape: f32[1,4], index: 6, kind: input, shape index: {}]   ;;  %s604_s7 = inlined_call_operand.hbm [shape: f32[2,4], index: 7, kind: output, shape index: {}]  }
   0x1   :  { %v29_v0 = vld [vmem:[%s598_s1] sm:$0xf]  ;;  %368 = vmatprep.subr.bf16.mxu0 %v459_v1  ;;  %370 = vmatprep.mubr.msk.bf16.mxu0 %vm460_vm2, %v459_v1  ;;  %v418_v5 = vld [vmem:[%s600_s3 + $0x8] sm:$0xff]   ;;  %v419_v6 = vld [vmem:[%s600_s3 + $0x10] sm:$0xff]  }
   0x2   :  { %v43_v2 = vsel %vm41_vm0, %v29_v0, 0  ;;  %v28_v3 = vld [vmem:[%s597_s0] sm:$0x1]  ;;  %374 = vmatprep.subr.bf16.mxu1 %v459_v1  ;;  %390 = vmatprep.mubr.msk.bf16.mxu1 %vm460_vm2, %v459_v1  ;;  %v420_v7 = vld [vmem:[%s600_s3 + $0x18] sm:$0xff]  }
   0x3   :  { %v417_v4 = vld [vmem:[%s600_s3] sm:$0xff]   ;;  %369 = vmatpush3.bf16.msra.mxu0 %v43_v2 }
   0x4   :  { %375 = vmatpush3.bf16.msra.mxu1 %v417_v4  ;;  %394 = vmatprep.subr.bf16.mxu0 %v459_v1 }
   0x5   :  { %376 = vmatprep.subr.bf16.mxu1 %v459_v1 }
   0x6   :  { %371 = vmatmul.mubr.msk.bf16.vlgmr.msra.gmra.mrb[0].mxu0 %vm37_vm1, %v28_v3 }
   0x7   :  { %410 = vmatprep.mubr.msk.bf16.mxu0 %vm460_vm2, %v459_v1 }
   0x8   :  { %377 = vmatpush3.bf16.msra.mxu1 %v418_v5 }
   0x9   :  { %378 = vmatprep.subr.bf16.mxu1 %v459_v1 }
   0xc   :  { %379 = vmatpush3.bf16.msra.mxu1 %v419_v6 }
   0xd   :  { %380 = vmatprep.subr.bf16.mxu1 %v459_v1 }
   0xe   :  { %12 = vsyncpa [#allocation3], 0  ;;  %v421_v8 = vld [vmem:[%s600_s3 + $0x20] sm:$0xff]   ;;  %v422_v9 = vld [vmem:[%s600_s3 + $0x28] sm:$0xff]   ;;  %vm312_vm3 = vcmask 25600  }
   0xf   :  { %v423_v10 = vld [vmem:[%s600_s3 + $0x30] sm:$0xff]   ;;  %v424_v11 = vld [vmem:[%s600_s3 + $0x38] sm:$0xff]   ;;  %v425_v12 = vld [vmem:[%s602_s5] sm:$0xff]  }
  0x10   :  { %381 = vmatpush3.bf16.msra.mxu1 %v420_v7  ;;  %395 = vmatpush3.bf16.msra.mxu0 %v425_v12  ;;  %v426_v13 = vld [vmem:[%s602_s5 + $0x8] sm:$0xff]   ;;  %v427_v14 = vld [vmem:[%s602_s5 + $0x10] sm:$0xff]   ;;  %v428_v15 = vld [vmem:[%s602_s5 + $0x18] sm:$0xff]  }
  0x11   :  { %382 = vmatprep.subr.bf16.mxu1 %v459_v1  ;;  %396 = vmatprep.subr.bf16.mxu0 %v459_v1  ;;  %v429_v16 = vld [vmem:[%s602_s5 + $0x20] sm:$0xff]   ;;  %v430_v17 = vld [vmem:[%s602_s5 + $0x28] sm:$0xff]   ;;  %v431_v26 = vld [vmem:[%s602_s5 + $0x30] sm:$0xff]  }
  0x12   :  { %v328_v18 = vld [vmem:[%s599_s2] ss:$0 sm:$0xff]  ;;  %v432_v27 = vld [vmem:[%s602_s5 + $0x38] sm:$0xff]   ;;  %s461_s5 = smov [#allocation2]  }
  0x13   :  { %v330_v28 = vld [vmem:[%s601_s4] ss:$0 sm:$0xff]  ;;  %s320_s4 = sshll.u32 %s461_s5, 4  ;;  %s321_s4 = int_to_ptr.vmem [resolvable:$true] %s320_s4 }
  0x14   :  { %383 = vmatpush3.bf16.msra.mxu1 %v421_v8  ;;  %397 = vmatpush3.bf16.msra.mxu0 %v426_v13  ;;  %v339_v36 = vld [vmem:[%s603_s6] ss:$0 sm:$0xff]  ;;  %s435_s14 = scalar_lea.vmem %s321_s4, 32  ;;  %p440_p1 = scmp.lt.s32.totalorder %s321_s4, %s321_s4 }
  0x15   :  { %384 = vmatprep.subr.bf16.mxu1 %v459_v1  ;;  %398 = vmatprep.subr.bf16.mxu0 %v459_v1  ;;  %p436_p0 = scmp.ne.s32.totalorder %s321_s4, %s435_s14  ;;  %p441_p2 = scmp.lt.s32.totalorder %s435_s14, %s435_s14 }
  0x17   :  { %p442_p3 = por %p441_p2, %p440_p1 }
  0x18   :  { %385 = vmatpush3.bf16.msra.mxu1 %v422_v9  ;;  %399 = vmatpush3.bf16.msra.mxu0 %v427_v14 }
  0x19   :  { %386 = vmatprep.subr.bf16.mxu1 %v459_v1  ;;  %400 = vmatprep.subr.bf16.mxu0 %v459_v1  ;;  %p443_p4 = pnand %p442_p3, %p436_p0 }
  0x1c   :  { %387 = vmatpush3.bf16.msra.mxu1 %v423_v10  ;;  %401 = vmatpush3.bf16.msra.mxu0 %v428_v15 }
  0x1d   :  { %388 = vmatprep.subr.bf16.mxu1 %v459_v1  ;;  %402 = vmatprep.subr.bf16.mxu0 %v459_v1 }
  0x20   :  { %389 = vmatpush3.bf16.msra.mxu1 %v424_v11  ;;  %403 = vmatpush3.bf16.msra.mxu0 %v429_v16 }
  0x21   :  { %404 = vmatprep.subr.bf16.mxu0 %v459_v1 }
  0x24   :  { %405 = vmatpush3.bf16.msra.mxu0 %v430_v17 }
  0x25   :  { %406 = vmatprep.subr.bf16.mxu0 %v459_v1 }
  0x28   :  { %407 = vmatpush3.bf16.msra.mxu0 %v431_v26 }
  0x29   :  { %408 = vmatprep.subr.bf16.mxu0 %v459_v1 }
  0x2c   :  { %409 = vmatpush3.bf16.msra.mxu0 %v432_v27 }
  0xd9   :  { %v79_v19 = vpop.f32.mrb[0].mxu0 }
  0xda   :  { %v80_v20 = vadd.f32 %v328_v18, %v79_v19  ;;  %v372_v21 = vpop.f32.mrb[1].mxu0 }
  0xdb   :  { %v82_v22 = vpop.f32.mrb[2].mxu0 }
  0xdc   :  { %v85_v23 = vmax.f32 %v80_v20, 0.0  ;;  %v373_v24 = vpop.f32.mrb[3].mxu0 }
  0xde   :  { %v86_v25 = vpack.c.bf16 %v85_v23, %v85_v23 }
  0xe0   :  { %391 = vmatmul.mubr.bf16.vlgmr.msra.gmra.mrb[0].mxu1 %v86_v25 }
 0x1b3   :  { %v192_v29 = vpop.f32.mrb[0].mxu1 }
 0x1b4   :  { %v193_v30 = vadd.f32 %v330_v28, %v192_v29  ;;  %v392_v31 = vpop.f32.mrb[1].mxu1 }
 0x1b5   :  { %v195_v32 = vpop.f32.mrb[2].mxu1 }
 0x1b6   :  { %v198_v33 = vmax.f32 %v193_v30, 0.0  ;;  %v393_v34 = vpop.f32.mrb[3].mxu1 }
 0x1b8   :  { %v199_v35 = vpack.c.bf16 %v198_v33, %v198_v33 }
 0x1ba   :  { %411 = vmatmul.mubr.bf16.vlgmr.msra.gmra.mrb[4].mxu0 %v199_v35 }
 0x28d   :  { %v305_v37 = vpop.f32.mrb[4].mxu0 }
 0x28e   :  { %v306_v38 = vadd.f32 %v339_v36, %v305_v37  ;;  %v412_v39 = vpop.f32.mrb[5].mxu0 }
 0x28f   :  { %v308_v40 = vpop.f32.mrb[6].mxu0 }
 0x290   :  { %433 = vtanh.f32 %v306_v38  ;;  %v413_v41 = vpop.f32.mrb[7].mxu0 }
 0x29a   :  { %v434_v42 = vpop.eup %433 }
 0x29b   :  { %313 = vst.msk [vmem:[#allocation2] sm:$0x3] %vm312_vm3, %v434_v42 }
 0x29c   :  { %446 = shalt.err (!%p443_p4)
}
 0x29d   :  { %s447_s16 = scalar_lea.hbm %s604_s7, 32 }
 0x29e   :  { %p448_p5 = scmp.ne.s32.totalorder %s604_s7, %s447_s16  ;;  %p451_p6 = scmp.lt.u32.totalorder %s447_s16, %s604_s7 }
 0x2a0   :  { %p453_p7 = pnand %p451_p6, %p448_p5 }
 0x2a2   :  { %456 = shalt.err (!%p453_p7)
}
 0x2a3   :  { %323 = dma.vmem_to_hbm [thread:$0]  %s321_s4, 32, %s604_s7, [#allocation3]  }
 0x2a4   :  { %457 = dma.done.wait [#allocation3], 32  }
 0x2a5   :  { %458 = vsyncadd [#allocation3], 4294967264 }
 0x2a6   :  { %327 = vsyncpa [#allocation3], 1 }

</bundles_post_ra>
